<compile_context>
chip_gen: v5e
topology: v5e:2x2
jax: 0.10.0
libtpu: 0.0.40
codegen_flags: <defaults>
</compile_context>

<pallas_src>
import jax
import jax.numpy as jnp
from jax.experimental import pallas as pl
from jax.experimental.pallas import tpu as pltpu

LANE = 128     # lane width (last dim alignment)
SUBLANE = 8    # sublane width (second-to-last dim alignment)


def _round_up(n, m):
    return (n + m - 1) // m * m


def _mlp_kernel(x_ref, w1_ref, b1_ref, w2_ref, b2_ref, w3_ref, b3_ref, o_ref):
    """One batch tile: full forward pass (4 matmuls + 4 ReLUs + final matmul)."""
    x = x_ref[...]                                                   # (TB, d_in_p) bf16
    # lin1 + ReLU
    h = jnp.dot(x, w1_ref[...], preferred_element_type=jnp.float32) + b1_ref[...]
    h = jnp.maximum(h, 0.0)
    # lin2 applied three times with the SAME weights (matches the PyTorch forward).
    w2 = w2_ref[...]
    b2 = jnp.broadcast_to(b2_ref[...], h.shape)                      # hoist: broadcast once
    for _ in range(3):
        h = jnp.dot(h.astype(w2.dtype), w2, preferred_element_type=jnp.float32) + b2
        h = jnp.maximum(h, 0.0)
    # lin3
    y = jnp.dot(h.astype(w3_ref.dtype), w3_ref[...],
                preferred_element_type=jnp.float32) + b3_ref[...]
    o_ref[...] = y.astype(o_ref.dtype)


def mnist_nn_forward(x, params, *, compute_dtype=jnp.bfloat16):
    """x: (B, 1, H, H) float32; params: dict with (in, out)-layout weights. Returns (B, d_out)."""
    b = x.shape[0]
    d_in = x.shape[2] * x.shape[2]          # matches x.reshape((B, shape[2]*shape[2]))
    x2d = x.reshape((b, d_in))

    w1, b1 = params["w1"], params["b1"]     # (d_in, d_h), (1, d_h)
    w2, b2 = params["w2"], params["b2"]     # (d_h, d_h),  (1, d_h)
    w3, b3 = params["w3"], params["b3"]     # (d_h, d_out),(1, d_out)
    d_h, d_out = w2.shape[1], w3.shape[1]

    # Lane-dense padded feature dims (zero padding is exact; output sliced back).
    d_in_p = _round_up(d_in, LANE)
    d_h_p = _round_up(d_h, LANE)
    d_out_p = _round_up(d_out, LANE)

    # Batch tile: multiple of 8 sublanes, capped at 512 rows (fits comfortably in VMEM
    # on v5e/v6e/v7x while still ~85%+ of HBM roofline for large batches).
    tb = min(512, _round_up(b, SUBLANE))
    b_p = _round_up(b, tb)

    xp = jnp.zeros((b_p, d_in_p), compute_dtype).at[:b, :d_in].set(
        x2d.astype(compute_dtype))

    def pad_w(w, rows, cols):
        return jnp.zeros((rows, cols), compute_dtype).at[:w.shape[0], :w.shape[1]].set(
            w.astype(compute_dtype))

    def pad_b(v, cols):
        return jnp.zeros((1, cols), jnp.float32).at[:, :v.shape[1]].set(
            v.astype(jnp.float32))

    w1p, b1p = pad_w(w1, d_in_p, d_h_p), pad_b(b1, d_h_p)
    w2p, b2p = pad_w(w2, d_h_p, d_h_p), pad_b(b2, d_h_p)
    w3p, b3p = pad_w(w3, d_h_p, d_out_p), pad_b(b3, d_out_p)

    grid = (b_p // tb,)

    def resident(shape):
        # Weights/biases: same block for every grid step -> stay resident in VMEM.
        return pl.BlockSpec(shape, lambda i: (0, 0))

    itemsize = jnp.dtype(compute_dtype).itemsize
    flops = 2 * b_p * (d_in_p * d_h_p + 3 * d_h_p * d_h_p + d_h_p * d_out_p)
    bytes_accessed = (
        xp.size * itemsize
        + (w1p.size + w2p.size + w3p.size) * itemsize
        + (b1p.size + b2p.size + b3p.size) * 4
        + b_p * d_out_p * 4)

    out_p = pl.pallas_call(
        _mlp_kernel,
        out_shape=jax.ShapeDtypeStruct((b_p, d_out_p), jnp.float32),
        grid=grid,
        in_specs=[
            pl.BlockSpec((tb, d_in_p), lambda i: (i, 0)),        # x: tiled over batch
            resident((d_in_p, d_h_p)), resident((1, d_h_p)),     # lin1
            resident((d_h_p, d_h_p)), resident((1, d_h_p)),      # lin2 (shared)
            resident((d_h_p, d_out_p)), resident((1, d_out_p)),  # lin3
        ],
        out_specs=pl.BlockSpec((tb, d_out_p), lambda i: (i, 0)),
        compiler_params=pltpu.CompilerParams(
            dimension_semantics=("parallel",)),
        cost_estimate=pl.CostEstimate(
            flops=flops, transcendentals=0, bytes_accessed=bytes_accessed),
    )(xp, w1p, b1p, w2p, b2p, w3p, b3p)

    return out_p[:b, :d_out]


def init_params(key, d_in, d_h, d_out):
    """Deterministic init mimicking torch.nn.Linear default (uniform +- 1/sqrt(fan_in))."""
    ks = jax.random.split(key, 6)

    def lin(kw, kb, fan_in, fan_out):
        bound = 1.0 / jnp.sqrt(fan_in)
        w = jax.random.uniform(kw, (fan_in, fan_out), jnp.float32, -bound, bound)
        b = jax.random.uniform(kb, (1, fan_out), jnp.float32, -bound, bound)
        return w, b

    w1, b1 = lin(ks[0], ks[1], d_in, d_h)
    w2, b2 = lin(ks[2], ks[3], d_h, d_h)
    w3, b3 = lin(ks[4], ks[5], d_h, d_out)
    return {"w1": w1, "b1": b1, "w2": w2, "b2": b2, "w3": w3, "b3": b3}


def _reference(x, p):
    """Pure-JAX reference with the same bf16-input / f32-accumulate matmul numerics."""
    b = x.shape[0]
    h = x.reshape((b, x.shape[2] * x.shape[2]))

    def dot(a, w):
        return jnp.dot(a.astype(jnp.bfloat16), w.astype(jnp.bfloat16),
                       preferred_element_type=jnp.float32)

    h = jnp.maximum(dot(h, p["w1"]) + p["b1"], 0.0)
    for _ in range(3):
        h = jnp.maximum(dot(h, p["w2"]) + p["b2"], 0.0)
    return dot(h, p["w3"]) + p["b3"]


if __name__ == "__main__":
    key = jax.random.PRNGKey(0)
    k_x, k_p = jax.random.split(key)

    B, C, H = 2, 1, 16                      # channels must be 1: reshape uses H*H only
    d_in, d_h, d_out = H * H, 32, 10

    x = jax.random.normal(k_x, (B, C, H, H), jnp.float32)
    params = init_params(k_p, d_in, d_h, d_out)

    out = mnist_nn_forward(x, params)
    out = jax.block_until_ready(out)

    ref = _reference(x, params)
    assert out.shape == (B, d_out)
    assert jnp.allclose(out, ref, atol=5e-3, rtol=5e-3)
    print("KERNEL_OK")
</pallas_src>

<mosaic_0001>
module attributes {stable_mosaic.version = 11 : i64} {
  func.func @_mlp_kernel(%arg0: i32, %arg1: memref<8x256xbf16, #tpu.memory_space<vmem>>, %arg2: memref<256x128xbf16, #tpu.memory_space<vmem>>, %arg3: memref<1x128xf32, #tpu.memory_space<vmem>>, %arg4: memref<128x128xbf16, #tpu.memory_space<vmem>>, %arg5: memref<1x128xf32, #tpu.memory_space<vmem>>, %arg6: memref<128x128xbf16, #tpu.memory_space<vmem>>, %arg7: memref<1x128xf32, #tpu.memory_space<vmem>>, %arg8: memref<8x128xf32, #tpu.memory_space<vmem>>) attributes {dimension_semantics = [#tpu.dimension_semantics<parallel>], iteration_bounds = array<i64: 1>, scalar_prefetch = 0 : i64, scratch_operands = 0 : i64, tpu.core_type = #tpu.core_type<tc>, window_params = [{transform_indices = @transform_0, window_bounds = array<i64: 8, 256>}, {pipeline_mode = #tpu.pipeline_mode<synchronous>, transform_indices = @transform_1, window_bounds = array<i64: 256, 128>}, {pipeline_mode = #tpu.pipeline_mode<synchronous>, transform_indices = @transform_2, window_bounds = array<i64: 1, 128>}, {pipeline_mode = #tpu.pipeline_mode<synchronous>, transform_indices = @transform_3, window_bounds = array<i64: 128, 128>}, {pipeline_mode = #tpu.pipeline_mode<synchronous>, transform_indices = @transform_4, window_bounds = array<i64: 1, 128>}, {pipeline_mode = #tpu.pipeline_mode<synchronous>, transform_indices = @transform_5, window_bounds = array<i64: 128, 128>}, {pipeline_mode = #tpu.pipeline_mode<synchronous>, transform_indices = @transform_6, window_bounds = array<i64: 1, 128>}, {transform_indices = @transform_7, window_bounds = array<i64: 8, 128>}]} {
    %c0 = arith.constant 0 : index
    %c0_0 = arith.constant 0 : index
    %0 = vector.load %arg1[%c0, %c0_0] : memref<8x256xbf16, #tpu.memory_space<vmem>>, vector<8x256xbf16>
    %c0_1 = arith.constant 0 : index
    %c0_2 = arith.constant 0 : index
    %1 = vector.load %arg2[%c0_1, %c0_2] : memref<256x128xbf16, #tpu.memory_space<vmem>>, vector<256x128xbf16>
    %cst = arith.constant dense<0.000000e+00> : vector<8x128xf32>
    %2 = tpu.matmul %0, %1, %cst {dimension_numbers = #tpu.dot_dimension_numbers<[1], [0], [0], [1], [0, 0, 1, 1], [], []>} : vector<8x256xbf16>, vector<256x128xbf16>, vector<8x128xf32> -> vector<8x128xf32>
    %c0_3 = arith.constant 0 : index
    %c0_4 = arith.constant 0 : index
    %3 = vector.load %arg3[%c0_3, %c0_4] : memref<1x128xf32, #tpu.memory_space<vmem>>, vector<1x128xf32>
    %4 = vector.broadcast %3 : vector<1x128xf32> to vector<8x128xf32>
    %5 = arith.addf %2, %4 : vector<8x128xf32>
    %cst_5 = arith.constant 0.000000e+00 : f32
    %6 = vector.broadcast %cst_5 : f32 to vector<8x128xf32>
    %7 = arith.maximumf %5, %6 : vector<8x128xf32>
    %c0_6 = arith.constant 0 : index
    %c0_7 = arith.constant 0 : index
    %8 = vector.load %arg4[%c0_6, %c0_7] : memref<128x128xbf16, #tpu.memory_space<vmem>>, vector<128x128xbf16>
    %c0_8 = arith.constant 0 : index
    %c0_9 = arith.constant 0 : index
    %9 = vector.load %arg5[%c0_8, %c0_9] : memref<1x128xf32, #tpu.memory_space<vmem>>, vector<1x128xf32>
    %10 = vector.shape_cast %9 : vector<1x128xf32> to vector<1x128xf32>
    %11 = vector.broadcast %10 : vector<1x128xf32> to vector<8x128xf32>
    %12 = arith.truncf %7 : vector<8x128xf32> to vector<8x128xbf16>
    %cst_10 = arith.constant dense<0.000000e+00> : vector<8x128xf32>
    %13 = tpu.matmul %12, %8, %cst_10 {dimension_numbers = #tpu.dot_dimension_numbers<[1], [0], [0], [1], [0, 0, 1, 1], [], []>} : vector<8x128xbf16>, vector<128x128xbf16>, vector<8x128xf32> -> vector<8x128xf32>
    %14 = arith.addf %13, %11 : vector<8x128xf32>
    %cst_11 = arith.constant 0.000000e+00 : f32
    %15 = vector.broadcast %cst_11 : f32 to vector<8x128xf32>
    %16 = arith.maximumf %14, %15 : vector<8x128xf32>
    %17 = arith.truncf %16 : vector<8x128xf32> to vector<8x128xbf16>
    %cst_12 = arith.constant dense<0.000000e+00> : vector<8x128xf32>
    %18 = tpu.matmul %17, %8, %cst_12 {dimension_numbers = #tpu.dot_dimension_numbers<[1], [0], [0], [1], [0, 0, 1, 1], [], []>} : vector<8x128xbf16>, vector<128x128xbf16>, vector<8x128xf32> -> vector<8x128xf32>
    %19 = arith.addf %18, %11 : vector<8x128xf32>
    %cst_13 = arith.constant 0.000000e+00 : f32
    %20 = vector.broadcast %cst_13 : f32 to vector<8x128xf32>
    %21 = arith.maximumf %19, %20 : vector<8x128xf32>
    %22 = arith.truncf %21 : vector<8x128xf32> to vector<8x128xbf16>
    %cst_14 = arith.constant dense<0.000000e+00> : vector<8x128xf32>
    %23 = tpu.matmul %22, %8, %cst_14 {dimension_numbers = #tpu.dot_dimension_numbers<[1], [0], [0], [1], [0, 0, 1, 1], [], []>} : vector<8x128xbf16>, vector<128x128xbf16>, vector<8x128xf32> -> vector<8x128xf32>
    %24 = arith.addf %23, %11 : vector<8x128xf32>
    %cst_15 = arith.constant 0.000000e+00 : f32
    %25 = vector.broadcast %cst_15 : f32 to vector<8x128xf32>
    %26 = arith.maximumf %24, %25 : vector<8x128xf32>
    %27 = arith.truncf %26 : vector<8x128xf32> to vector<8x128xbf16>
    %c0_16 = arith.constant 0 : index
    %c0_17 = arith.constant 0 : index
    %28 = vector.load %arg6[%c0_16, %c0_17] : memref<128x128xbf16, #tpu.memory_space<vmem>>, vector<128x128xbf16>
    %cst_18 = arith.constant dense<0.000000e+00> : vector<8x128xf32>
    %29 = tpu.matmul %27, %28, %cst_18 {dimension_numbers = #tpu.dot_dimension_numbers<[1], [0], [0], [1], [0, 0, 1, 1], [], []>} : vector<8x128xbf16>, vector<128x128xbf16>, vector<8x128xf32> -> vector<8x128xf32>
    %c0_19 = arith.constant 0 : index
    %c0_20 = arith.constant 0 : index
    %30 = vector.load %arg7[%c0_19, %c0_20] : memref<1x128xf32, #tpu.memory_space<vmem>>, vector<1x128xf32>
    %31 = vector.broadcast %30 : vector<1x128xf32> to vector<8x128xf32>
    %32 = arith.addf %29, %31 : vector<8x128xf32>
    %c0_21 = arith.constant 0 : index
    %c0_22 = arith.constant 0 : index
    %33 = vector.load %arg8[%c0_21, %c0_22] : memref<8x128xf32, #tpu.memory_space<vmem>>, vector<8x128xf32>
    tpu.vector_store %arg8[%c0_21, %c0_22], %32 {strides = array<i32>} : memref<8x128xf32, #tpu.memory_space<vmem>>, vector<8x128xf32>,
    return
  }
  func.func @transform_0(%arg0: i32) -> (i32, i32) {
    %c0_i32 = arith.constant 0 : i32
    %c0_i32_0 = arith.constant 0 : i32
    return %arg0, %c0_i32 : i32, i32
  }
  func.func @transform_1(%arg0: i32) -> (i32, i32) {
    %c0_i32 = arith.constant 0 : i32
    %c0_i32_0 = arith.constant 0 : i32
    %c0_i32_1 = arith.constant 0 : i32
    return %c0_i32, %c0_i32_0 : i32, i32
  }
  func.func @transform_2(%arg0: i32) -> (i32, i32) {
    %c0_i32 = arith.constant 0 : i32
    %c0_i32_0 = arith.constant 0 : i32
    %c0_i32_1 = arith.constant 0 : i32
    return %c0_i32, %c0_i32_0 : i32, i32
  }
  func.func @transform_3(%arg0: i32) -> (i32, i32) {
    %c0_i32 = arith.constant 0 : i32
    %c0_i32_0 = arith.constant 0 : i32
    %c0_i32_1 = arith.constant 0 : i32
    return %c0_i32, %c0_i32_0 : i32, i32
  }
  func.func @transform_4(%arg0: i32) -> (i32, i32) {
    %c0_i32 = arith.constant 0 : i32
    %c0_i32_0 = arith.constant 0 : i32
    %c0_i32_1 = arith.constant 0 : i32
    return %c0_i32, %c0_i32_0 : i32, i32
  }
  func.func @transform_5(%arg0: i32) -> (i32, i32) {
    %c0_i32 = arith.constant 0 : i32
    %c0_i32_0 = arith.constant 0 : i32
    %c0_i32_1 = arith.constant 0 : i32
    return %c0_i32, %c0_i32_0 : i32, i32
  }
  func.func @transform_6(%arg0: i32) -> (i32, i32) {
    %c0_i32 = arith.constant 0 : i32
    %c0_i32_0 = arith.constant 0 : i32
    %c0_i32_1 = arith.constant 0 : i32
    return %c0_i32, %c0_i32_0 : i32, i32
  }
  func.func @transform_7(%arg0: i32) -> (i32, i32) {
    %c0_i32 = arith.constant 0 : i32
    %c0_i32_0 = arith.constant 0 : i32
    return %arg0, %c0_i32 : i32, i32
  }
}

</mosaic_0001>

<bundles_post_ra>
// kernel: tpu_custom_call.1
= control target key start
LH: loop header
LB: loop body
LE: loop exit
PB: predicated region body
PF: predicated region fallthrough
CT: control target
= control target key end

     0   :  { %12 = vsyncpa [#allocation3], 0  ;;  %s839_s0 = inlined_call_operand.hbm [shape: bf16[8,256], index: 0, kind: input, shape index: {}]   ;;  %s840_s1 = inlined_call_operand.hbm [shape: bf16[256,128], index: 1, kind: input, shape index: {}]   ;;  %s841_s2 = inlined_call_operand.vmem [shape: f32[1,128], index: 2, kind: input, shape index: {}]   ;;  %s842_s3 = inlined_call_operand.hbm [shape: bf16[128,128], index: 3, kind: input, shape index: {}]   ;;  %s843_s4 = inlined_call_operand.vmem [shape: f32[1,128], index: 4, kind: input, shape index: {}]   ;;  %s844_s5 = inlined_call_operand.hbm [shape: bf16[128,128], index: 5, kind: input, shape index: {}]   ;;  %s845_s6 = inlined_call_operand.vmem [shape: f32[1,128], index: 6, kind: input, shape index: {}]   ;;  %s846_s7 = inlined_call_operand.hbm [shape: f32[8,128], index: 7, kind: output, shape index: {}]  }
   0x1   :  { %13 = vsyncpa [#allocation6], 0 }
   0x2   :  { %14 = vsyncpa [#allocation9], 0  ;;  %s31_s26 = sshll.u32 %s840_s1, 4  ;;  %s32_s26 = int_to_ptr.hbm [resolvable:$true] %s31_s26 }
   0x3   :  { %15 = vsyncpa [#allocation4], 0  ;;  %s768_s27 = smov [#allocation5]   ;;  %s21_s8 = sshll.u32 %s839_s0, 4  ;;  %s22_s8 = int_to_ptr.hbm [resolvable:$true] %s21_s8 }
   0x4   :  { %s33_s28 = sshll.u32 %s768_s27, 4  ;;  %s769_s9 = smov 64   ;;  %s34_s28 = int_to_ptr.vmem [resolvable:$true] %s33_s28 }
   0x5   :  { %s770_s10 = smov 4   ;;  %s771_s11 = smov [#allocation2]  }
   0x6   :  { %39 = dma.hbm_to_vmem [thread:$0]  %s32_s26, 2048, %s34_s28, [#allocation6], %s769_s9, %s769_s9, %s770_s10  }
   0x7   :  { %s23_s12 = sshll.u32 %s771_s11, 4  ;;  %s46_s15 = sshll.u32 %s842_s3, 4  ;;  %s24_s12 = int_to_ptr.vmem [resolvable:$true] %s23_s12  ;;  %s47_s15 = int_to_ptr.hbm [resolvable:$true] %s46_s15 }
   0x8   :  { %26 = dma.hbm_to_vmem [thread:$0]  %s22_s8, 128, %s24_s12, [#allocation3]  }
   0x9   :  { %s61_s17 = sshll.u32 %s844_s5, 4  ;;  %s772_s18 = smov [#allocation7]   ;;  %s62_s17 = int_to_ptr.hbm [resolvable:$true] %s61_s17 }
   0xa   :  { %s48_s19 = sshll.u32 %s772_s18, 4  ;;  %s773_s0 = smov [#allocation8]   ;;  %s49_s19 = int_to_ptr.vmem [resolvable:$true] %s48_s19 }
   0xb   :  { %54 = dma.hbm_to_vmem [thread:$0]  %s47_s15, 1024, %s49_s19, [#allocation6], %s769_s9, %s769_s9, %s770_s10  }
   0xc   :  { %s63_s20 = sshll.u32 %s773_s0, 4  ;;  %s64_s20 = int_to_ptr.vmem [resolvable:$true] %s63_s20 }
   0xd   :  { %69 = dma.hbm_to_vmem [thread:$0]  %s62_s17, 1024, %s64_s20, [#allocation9], %s769_s9, %s769_s9, %s770_s10  }
   0xe   :  { %760 = dma.done.wait [#allocation3], 128  }
   0xf   :  { %761 = vsyncadd [#allocation3], 4294967168 }
  0x10   :  { %762 = dma.done.wait [#allocation6], 3072  }
  0x11   :  { %763 = vsyncadd [#allocation6], 4294964224 }
  0x12   :  { %764 = dma.done.wait [#allocation9], 1024  }
  0x13   :  { %765 = vsyncadd [#allocation9], 4294966272  ;;  %v605_v0 = vld [vmem:[#allocation5 + $0x38] sm:$0xff]  ;;  %v604_v2 = vld [vmem:[#allocation5 + $0x30] sm:$0xff]  ;;  %s774_s23 = smov [#allocation10]   ;;  %s458_s27 = sshll.u32 %s846_s7, 4  ;;  %s459_s27 = int_to_ptr.hbm [resolvable:$true] %s458_s27 }
  0x14   :  { %v613_v1 = vld [vmem:[#allocation5 + $0x78] sm:$0xff]  ;;  %228 = vmatpush.bf16.msra.mxu0 %v605_v0  ;;  %v612_v3 = vld [vmem:[#allocation5 + $0x70] sm:$0xff]  ;;  %v603_v5 = vld [vmem:[#allocation5 + $0x28] sm:$0xff]  ;;  %s456_s24 = sshll.u32 %s774_s23, 4  ;;  %s457_s24 = int_to_ptr.vmem [resolvable:$true] %s456_s24 }
  0x15   :  { %241 = vmatpush.bf16.msra.mxu1 %v613_v1  ;;  %v621_v4 = vld [vmem:[#allocation7 + $0x38] sm:$0xff]  ;;  %v611_v6 = vld [vmem:[#allocation5 + $0x68] sm:$0xff]  ;;  %v620_v7 = vld [vmem:[#allocation7 + $0x30] sm:$0xff] }
  0x16   :  { %324 = vmatpush.bf16.msra.mxu2 %v621_v4  ;;  %339 = vmatpush.bf16.msra.mxu3 %v621_v4  ;;  %v602_v8 = vld [vmem:[#allocation5 + $0x20] sm:$0xff]  ;;  %v619_v10 = vld [vmem:[#allocation7 + $0x28] sm:$0xff]  ;;  %v601_v11 = vld [vmem:[#allocation5 + $0x18] sm:$0xff] }
  0x17   :  { %v610_v9 = vld [vmem:[#allocation5 + $0x60] sm:$0xff]  ;;  %v609_v12 = vld [vmem:[#allocation5 + $0x58] sm:$0xff]  ;;  %v600_v14 = vld [vmem:[#allocation5 + $0x10] sm:$0xff] }
  0x18   :  { %229 = vmatpush.bf16.msra.mxu0 %v604_v2  ;;  %v618_v13 = vld [vmem:[#allocation7 + $0x20] sm:$0xff]  ;;  %v608_v15 = vld [vmem:[#allocation5 + $0x50] sm:$0xff]  ;;  %v617_v16 = vld [vmem:[#allocation7 + $0x18] sm:$0xff] }
  0x19   :  { %242 = vmatpush.bf16.msra.mxu1 %v612_v3  ;;  %v599_v17 = vld [vmem:[#allocation5 + $0x8] sm:$0xff]  ;;  %v88_v19 = vld [vmem:[#allocation2] sm:$0xff]  ;;  %v616_v20 = vld [vmem:[#allocation7 + $0x10] sm:$0xff] }
  0x1a   :  { %325 = vmatpush.bf16.msra.mxu2 %v620_v7  ;;  %340 = vmatpush.bf16.msra.mxu3 %v620_v7  ;;  %v607_v18 = vld [vmem:[#allocation5 + $0x48] sm:$0xff]  ;;  %v126_v21 = vunpack.c.l.b16 %v88_v19  ;;  %v127_v22 = vunpack.c.h.b16 %v88_v19  ;;  %v598_v23 = vld [vmem:[#allocation5] sm:$0xff]  ;;  %v637_v29 = vld [vmem:[%s841_s2] ss:$0 sm:$0xff] }
  0x1b   :  { %v606_v24 = vld [vmem:[#allocation5 + $0x40] sm:$0xff]  ;;  %v615_v27 = vld [vmem:[#allocation7 + $0x8] sm:$0xff]  ;;  %v638_v38 = vld [vmem:[%s843_s4] ss:$0 sm:$0xff] }
  0x1c   :  { %230 = vmatpush.bf16.msra.mxu0 %v603_v5  ;;  %v128_v25 = vpack.c.b16 %v126_v21, %v126_v21  ;;  %v129_v26 = vpack.c.b16 %v127_v22, %v127_v22  ;;  %v614_v28 = vld [vmem:[#allocation7] sm:$0xff]  ;;  %v629_v44 = vld [vmem:[#allocation8 + $0x38] sm:$0xff]  ;;  %v628_v45 = vld [vmem:[#allocation8 + $0x30] sm:$0xff] }
  0x1d   :  { %243 = vmatpush.bf16.msra.mxu1 %v611_v6  ;;  %v627_v46 = vld [vmem:[#allocation8 + $0x28] sm:$0xff]  ;;  %v626_v47 = vld [vmem:[#allocation8 + $0x20] sm:$0xff]  ;;  %v625_v48 = vld [vmem:[#allocation8 + $0x18] sm:$0xff] }
  0x1e   :  { %326 = vmatpush.bf16.msra.mxu2 %v619_v10  ;;  %341 = vmatpush.bf16.msra.mxu3 %v619_v10  ;;  %v624_v49 = vld [vmem:[#allocation8 + $0x10] sm:$0xff]  ;;  %v623_v55 = vld [vmem:[#allocation8 + $0x8] sm:$0xff]  ;;  %v622_v56 = vld [vmem:[#allocation8] sm:$0xff] }
  0x1f   :  { %v639_v62 = vld [vmem:[%s845_s6] ss:$0 sm:$0xff] }
  0x20   :  { %231 = vmatpush.bf16.msra.mxu0 %v602_v8 }
  0x21   :  { %244 = vmatpush.bf16.msra.mxu1 %v610_v9 }
  0x22   :  { %327 = vmatpush.bf16.msra.mxu2 %v618_v13  ;;  %342 = vmatpush.bf16.msra.mxu3 %v618_v13 }
  0x24   :  { %232 = vmatpush.bf16.msra.mxu0 %v601_v11 }
  0x25   :  { %245 = vmatpush.bf16.msra.mxu1 %v609_v12 }
  0x26   :  { %328 = vmatpush.bf16.msra.mxu2 %v617_v16  ;;  %343 = vmatpush.bf16.msra.mxu3 %v617_v16 }
  0x28   :  { %233 = vmatpush.bf16.msra.mxu0 %v600_v14 }
  0x29   :  { %246 = vmatpush.bf16.msra.mxu1 %v608_v15 }
  0x2a   :  { %329 = vmatpush.bf16.msra.mxu2 %v616_v20  ;;  %344 = vmatpush.bf16.msra.mxu3 %v616_v20 }
  0x2c   :  { %234 = vmatpush.bf16.msra.mxu0 %v599_v17 }
  0x2d   :  { %247 = vmatpush.bf16.msra.mxu1 %v607_v18 }
  0x2e   :  { %330 = vmatpush.bf16.msra.mxu2 %v615_v27  ;;  %345 = vmatpush.bf16.msra.mxu3 %v615_v27 }
  0x30   :  { %235 = vmatpush.bf16.msra.mxu0 %v598_v23 }
  0x31   :  { %248 = vmatpush.bf16.msra.mxu1 %v606_v24 }
  0x32   :  { %331 = vmatpush.bf16.msra.mxu2 %v614_v28  ;;  %346 = vmatpush.bf16.msra.mxu3 %v614_v28 }
  0x33   :  { %236 = vmatmul.bf16.vlgmr.msra.gmra.mxu0 %v128_v25 }
  0x34   :  { %354 = vmatpush.bf16.msrb.mxu0 %v621_v4  ;;  %249 = vmatmul.bf16.vlgmr.msra.gmra.mxu1 %v129_v26 }
  0x35   :  { %437 = vmatpush.bf16.msrb.mxu1 %v629_v44 }
  0x38   :  { %355 = vmatpush.bf16.msrb.mxu0 %v620_v7 }
  0x39   :  { %438 = vmatpush.bf16.msrb.mxu1 %v628_v45 }
  0x3c   :  { %356 = vmatpush.bf16.msrb.mxu0 %v619_v10 }
  0x3d   :  { %439 = vmatpush.bf16.msrb.mxu1 %v627_v46 }
  0x40   :  { %357 = vmatpush.bf16.msrb.mxu0 %v618_v13 }
  0x41   :  { %440 = vmatpush.bf16.msrb.mxu1 %v626_v47 }
  0x44   :  { %358 = vmatpush.bf16.msrb.mxu0 %v617_v16 }
  0x45   :  { %441 = vmatpush.bf16.msrb.mxu1 %v625_v48 }
  0x48   :  { %359 = vmatpush.bf16.msrb.mxu0 %v616_v20 }
  0x49   :  { %442 = vmatpush.bf16.msrb.mxu1 %v624_v49 }
  0x4c   :  { %360 = vmatpush.bf16.msrb.mxu0 %v615_v27 }
  0x4d   :  { %443 = vmatpush.bf16.msrb.mxu1 %v623_v55 }
  0x50   :  { %361 = vmatpush.bf16.msrb.mxu0 %v614_v28 }
  0x51   :  { %444 = vmatpush.bf16.msrb.mxu1 %v622_v56 }
  0xb0   :  { %v237_v30 = vpop.f32.mrf.mxu0 }
  0xb1   :  { %v250_v31 = vpop.f32.mrf.mxu1  ;;  %v238_v32 = vadd.f32 %v637_v29, %v237_v30 }
  0xb3   :  { %v251_v33 = vadd.f32 %v250_v31, %v238_v32 }
  0xb5   :  { %v254_v34 = vmax.f32 %v251_v33, 0.0 }
  0xb7   :  { %v275_v35 = vpack.c.bf16 %v254_v34, %v254_v34 }
  0xb8   :  { %v239_v36 = vpop.f32.mrf.mxu0 }
  0xb9   :  { %v252_v37 = vpop.f32.mrf.mxu1  ;;  %332 = vmatmul.bf16.vlgmr.msra.gmra.mxu2 %v275_v35 }
 0x13c   :  { %v333_v39 = vpop.f32.mrf.mxu2 }
 0x13d   :  { %v334_v40 = vadd.f32 %v638_v38, %v333_v39 }
 0x13f   :  { %v337_v41 = vmax.f32 %v334_v40, 0.0 }
 0x141   :  { %v338_v42 = vpack.c.bf16 %v337_v41, %v337_v41 }
 0x143   :  { %347 = vmatmul.bf16.vlgmr.msra.gmra.mxu3 %v338_v42 }
 0x144   :  { %v335_v43 = vpop.f32.mrf.mxu2 }
 0x1c6   :  { %v348_v50 = vpop.f32.mrf.mxu3 }
 0x1c7   :  { %v349_v51 = vadd.f32 %v638_v38, %v348_v50 }
 0x1c9   :  { %v352_v52 = vmax.f32 %v349_v51, 0.0 }
 0x1cb   :  { %v353_v53 = vpack.c.bf16 %v352_v52, %v352_v52 }
 0x1cd   :  { %362 = vmatmul.bf16.vlgmr.msrb.gmra.mxu0 %v353_v53 }
 0x1ce   :  { %v350_v54 = vpop.f32.mrf.mxu3 }
 0x24a   :  { %v363_v57 = vpop.f32.mrf.mxu0 }
 0x24b   :  { %v364_v58 = vadd.f32 %v638_v38, %v363_v57 }
 0x24d   :  { %v367_v59 = vmax.f32 %v364_v58, 0.0 }
 0x24f   :  { %v368_v60 = vpack.c.bf16 %v367_v59, %v367_v59 }
 0x251   :  { %445 = vmatmul.bf16.vlgmr.msrb.gmra.mxu1 %v368_v60 }
 0x252   :  { %v365_v61 = vpop.f32.mrf.mxu0 }
 0x2ce   :  { %v446_v63 = vpop.f32.mrf.mxu1 }
 0x2cf   :  { %v447_v0 = vadd.f32 %v639_v62, %v446_v63 }
 0x2d1   :  { %450 = vst [vmem:[#allocation10] sm:$0xff] %v447_v0 }
 0x2d2   :  { %461 = dma.vmem_to_hbm [thread:$0]  %s457_s24, 128, %s459_s27, [#allocation4]  }
 0x2d6   :  { %v448_v1 = vpop.f32.mrf.mxu1 }
 0x2d7   :  { %766 = dma.done.wait [#allocation4], 128  }
 0x2d8   :  { %767 = vsyncadd [#allocation4], 4294967168 }
 0x2d9   :  { %466 = vsyncpa [#allocation3], 1 }
 0x2da   :  { %467 = vsyncpa [#allocation6], 1 }
 0x2db   :  { %468 = vsyncpa [#allocation9], 1 }
 0x2dc   :  { %469 = vsyncpa [#allocation4], 1 }

</bundles_post_ra>
